<compile_context>
chip_gen: v7x
topology: tpu7x:2x2x1
jax: 0.10.0
libtpu: 0.0.40
codegen_flags: <defaults>
</compile_context>

<pallas_src>
import math

import jax
import jax.numpy as jnp
from jax.experimental import pallas as pl
from jax.experimental.pallas import tpu as pltpu


# Per-tile budget: double-buffered (in + out) stays <= ~8 MiB, well under the
# scoped VMEM default on v5e (16 MiB) and v6e/v7x (32 MiB).
_MAX_TILE_BYTES = 2 << 20  # 2 MiB per tile


def _identity_kernel(x_ref, o_ref):
    # Pure full-tile copy. No in-kernel reshapes/transposes: keeps the kernel
    # DMA / HBM-bandwidth bound (v5e has only 1 vector-store slot per bundle).
    o_ref[...] = x_ref[...]


def dummy_body_forward(x):
    """Pallas implementation of DummyBody.forward: returns x (identity)."""
    orig_shape = x.shape
    total = math.prod(orig_shape) if orig_shape else 1
    itemsize = jnp.dtype(x.dtype).itemsize

    # Lane-dense width: largest large multiple of 128 that divides the flat size.
    lane = next((c for c in (1024, 512, 256, 128) if total % c == 0), None)

    if lane is None or total * itemsize <= _MAX_TILE_BYTES:
        # Tiny (or lane-awkward) inputs: single gridless whole-array block.
        # A full-array block is always tiling-legal; launch overhead is the
        # only cost, and output aliases input.
        # TODO(synk): lane-awkward inputs larger than VMEM would need padding.
        return pl.pallas_call(
            _identity_kernel,
            out_shape=jax.ShapeDtypeStruct(orig_shape, x.dtype),
            in_specs=[pl.BlockSpec(memory_space=pltpu.MemorySpace.VMEM)],
            out_specs=pl.BlockSpec(memory_space=pltpu.MemorySpace.VMEM),
            input_output_aliases={0: 0},
        )(x)

    # Production-sized path: flatten to (rows, lane) and tile rows.
    rows = total // lane
    max_block_rows = max(8, _MAX_TILE_BYTES // (lane * itemsize))

    block_rows = rows
    if rows > max_block_rows or rows % 8 != 0:
        # Largest multiple-of-8 divisor of rows that fits the tile budget.
        block_rows = None
        d = (min(rows, max_block_rows) // 8) * 8
        while d >= 8:
            if rows % d == 0:
                block_rows = d
                break
            d -= 8
        if block_rows is None:
            block_rows = rows  # full row extent is always legal

    x2 = x.reshape(rows, lane)
    y2 = pl.pallas_call(
        _identity_kernel,
        out_shape=jax.ShapeDtypeStruct((rows, lane), x.dtype),
        grid=(rows // block_rows,),
        in_specs=[pl.BlockSpec((block_rows, lane), lambda i: (i, 0))],
        out_specs=pl.BlockSpec((block_rows, lane), lambda i: (i, 0)),
        input_output_aliases={0: 0},
        compiler_params=pltpu.CompilerParams(
            dimension_semantics=("parallel",)),  # lets v7x shard across 2 TCs
    )(x2)
    return y2.reshape(orig_shape)


class DummyBody:
    """Mirror of the PyTorch module: no parameters, identity forward."""

    def __init__(self, state_dim):
        self.feature_dim = state_dim

    def __call__(self, x):
        return dummy_body_forward(x)


if __name__ == "__main__":
    key = jax.random.PRNGKey(0)
    body = DummyBody(state_dim=(4, 16, 16))

    # Small NCHW-like state tensor -> gridless whole-block (aliased) path.
    x_small = jax.random.normal(key, (2, 4, 16, 16), dtype=jnp.float32)
    y_small = jax.block_until_ready(body(x_small))
    assert y_small.shape == x_small.shape
    assert y_small.dtype == x_small.dtype
    assert bool(jnp.array_equal(y_small, x_small))

    # Larger tensor (8 MiB) -> lane-dense tiled, pipelined, parallel-grid path.
    x_big = jax.random.normal(key, (8, 16, 128, 128), dtype=jnp.float32)
    y_big = jax.block_until_ready(body(x_big))
    assert y_big.shape == x_big.shape
    assert y_big.dtype == x_big.dtype
    assert bool(jnp.array_equal(y_big, x_big))

    print("KERNEL_OK")
</pallas_src>

<mosaic_0001>
module attributes {stable_mosaic.version = 11 : i64} {
  func.func @_identity_kernel(%arg0: memref<2x4x16x16xf32, #tpu.memory_space<vmem>>, %arg1: memref<2x4x16x16xf32, #tpu.memory_space<vmem>>) attributes {dimension_semantics = [], scalar_prefetch = 0 : i64, scratch_operands = 0 : i64, tpu.core_type = #tpu.core_type<tc>} {
    %c0 = arith.constant 0 : index
    %c0_0 = arith.constant 0 : index
    %c0_1 = arith.constant 0 : index
    %c0_2 = arith.constant 0 : index
    %0 = vector.load %arg0[%c0, %c0_0, %c0_1, %c0_2] : memref<2x4x16x16xf32, #tpu.memory_space<vmem>>, vector<2x4x16x16xf32>
    %c0_3 = arith.constant 0 : index
    %c0_4 = arith.constant 0 : index
    %c0_5 = arith.constant 0 : index
    %c0_6 = arith.constant 0 : index
    %1 = vector.load %arg1[%c0_3, %c0_4, %c0_5, %c0_6] : memref<2x4x16x16xf32, #tpu.memory_space<vmem>>, vector<2x4x16x16xf32>
    tpu.vector_store %arg1[%c0_3, %c0_4, %c0_5, %c0_6], %0 {strides = array<i32>} : memref<2x4x16x16xf32, #tpu.memory_space<vmem>>, vector<2x4x16x16xf32>,
    return
  }
}

</mosaic_0001>

<bundles_post_ra>
// kernel: tpu_custom_call.1
= control target key start
LH: loop header
LB: loop body
LE: loop exit
PB: predicated region body
PF: predicated region fallthrough
CT: control target
= control target key end

     0   :  { %6 = vsyncpa [#allocation3], 0  ;;  %s185_s0 = inlined_call_operand.hbm [shape: f32[2,4,16,16], index: 0, kind: input, shape index: {}, may-alias: {0,1}]   ;;  %s186_s1 = inlined_call_operand.hbm [shape: f32[2,4,16,16], index: 1, kind: output, shape index: {}, may-alias: {0,1}]  }
   0x1   :  { %7 = vsyncpa [#allocation4], 0  ;;  %s125_s6 = smov [#allocation2]   ;;  %s77_s10 = scalar_lea.hbm %s185_s0, 2048 }
   0x2   :  { %s13_s7 = sshll.u32 %s125_s6, 4  ;;  %p78_p0 = scmp.ne.s32.totalorder %s185_s0, %s77_s10  ;;  %s14_s7 = int_to_ptr.vmem [resolvable:$true] %s13_s7 }
   0x3   :  { %p81_p1 = scmp.lt.u32.totalorder %s77_s10, %s185_s0 }
   0x5   :  { %p83_p2 = pnand %p81_p1, %p78_p0 }
   0x7   :  { %86 = shalt.err (!%p83_p2)
}
   0x8   :  { %s87_s15 = scalar_lea.vmem %s14_s7, 2048  ;;  %p92_p4 = scmp.lt.s32.totalorder %s14_s7, %s14_s7 }
   0x9   :  { %p88_p3 = scmp.ne.s32.totalorder %s14_s7, %s87_s15  ;;  %p93_p5 = scmp.lt.s32.totalorder %s87_s15, %s87_s15 }
   0xb   :  { %p94_p6 = por %p93_p5, %p92_p4 }
   0xd   :  { %p95_p7 = pnand %p94_p6, %p88_p3 }
   0xf   :  { %98 = shalt.err (!%p95_p7)
}
  0x10   :  { %s126_s16 = smov 128   ;;  %s127_s17 = smov 8  }
  0x11   :  { %19 = dma.hbm_to_vmem [thread:$0]  %s185_s0, 2048, %s14_s7, [#allocation3], %s126_s16, %s126_s16, %s127_s17  }
  0x12   :  { %121 = dma.done.wait [#allocation3], 2048  }
  0x13   :  { %122 = vsyncadd [#allocation3], 4294965248  ;;  %vm39_vm0 = vcmask 130048   ;;  %v23_v0 = vld [vmem:[#allocation2] sm:$0xff]  ;;  %v24_v1 = vld [vmem:[#allocation2 + $0x8] sm:$0xff]  ;;  %s128_s20 = smov [#allocation5]  }
  0x14   :  { %v25_v2 = vld [vmem:[#allocation2 + $0x10] sm:$0xff]  ;;  %40 = vst.msk [vmem:[#allocation5] sm:$0xff] %vm39_vm0, %v23_v0  ;;  %41 = vst.msk [vmem:[#allocation5 + $0x8] sm:$0xff] %vm39_vm0, %v24_v1  ;;  %v26_v3 = vld [vmem:[#allocation2 + $0x18] sm:$0xff]  ;;  %s61_s21 = sshll.u32 %s128_s20, 4  ;;  %s62_s21 = int_to_ptr.vmem [resolvable:$true] %s61_s21 }
  0x15   :  { %42 = vst.msk [vmem:[#allocation5 + $0x10] sm:$0xff] %vm39_vm0, %v25_v2  ;;  %v27_v4 = vld [vmem:[#allocation2 + $0x20] sm:$0xff]  ;;  %v28_v5 = vld [vmem:[#allocation2 + $0x28] sm:$0xff]  ;;  %43 = vst.msk [vmem:[#allocation5 + $0x18] sm:$0xff] %vm39_vm0, %v26_v3  ;;  %s99_s0 = scalar_lea.vmem %s62_s21, 2048  ;;  %p104_p9 = scmp.lt.s32.totalorder %s62_s21, %s62_s21 }
  0x16   :  { %44 = vst.msk [vmem:[#allocation5 + $0x20] sm:$0xff] %vm39_vm0, %v27_v4  ;;  %45 = vst.msk [vmem:[#allocation5 + $0x28] sm:$0xff] %vm39_vm0, %v28_v5  ;;  %v29_v6 = vld [vmem:[#allocation2 + $0x30] sm:$0xff]  ;;  %v30_v7 = vld [vmem:[#allocation2 + $0x38] sm:$0xff]  ;;  %p100_p8 = scmp.ne.s32.totalorder %s62_s21, %s99_s0  ;;  %p105_p10 = scmp.lt.s32.totalorder %s99_s0, %s99_s0 }
  0x17   :  { %v31_v8 = vld [vmem:[#allocation2 + $0x40] sm:$0xff]  ;;  %46 = vst.msk [vmem:[#allocation5 + $0x30] sm:$0xff] %vm39_vm0, %v29_v6  ;;  %47 = vst.msk [vmem:[#allocation5 + $0x38] sm:$0xff] %vm39_vm0, %v30_v7  ;;  %v32_v9 = vld [vmem:[#allocation2 + $0x48] sm:$0xff] }
  0x18   :  { %48 = vst.msk [vmem:[#allocation5 + $0x40] sm:$0xff] %vm39_vm0, %v31_v8  ;;  %v33_v10 = vld [vmem:[#allocation2 + $0x50] sm:$0xff]  ;;  %v34_v11 = vld [vmem:[#allocation2 + $0x58] sm:$0xff]  ;;  %49 = vst.msk [vmem:[#allocation5 + $0x48] sm:$0xff] %vm39_vm0, %v32_v9  ;;  %p106_p11 = por %p105_p10, %p104_p9 }
  0x19   :  { %50 = vst.msk [vmem:[#allocation5 + $0x50] sm:$0xff] %vm39_vm0, %v33_v10  ;;  %51 = vst.msk [vmem:[#allocation5 + $0x58] sm:$0xff] %vm39_vm0, %v34_v11  ;;  %v35_v12 = vld [vmem:[#allocation2 + $0x60] sm:$0xff]  ;;  %v36_v13 = vld [vmem:[#allocation2 + $0x68] sm:$0xff] }
  0x1a   :  { %v37_v14 = vld [vmem:[#allocation2 + $0x70] sm:$0xff]  ;;  %52 = vst.msk [vmem:[#allocation5 + $0x60] sm:$0xff] %vm39_vm0, %v35_v12  ;;  %53 = vst.msk [vmem:[#allocation5 + $0x68] sm:$0xff] %vm39_vm0, %v36_v13  ;;  %v38_v15 = vld [vmem:[#allocation2 + $0x78] sm:$0xff]  ;;  %p107_p12 = pnand %p106_p11, %p100_p8 }
  0x1b   :  { %54 = vst.msk [vmem:[#allocation5 + $0x70] sm:$0xff] %vm39_vm0, %v37_v14  ;;  %55 = vst.msk [vmem:[#allocation5 + $0x78] sm:$0xff] %vm39_vm0, %v38_v15 }
  0x1c   :  { %110 = shalt.err (!%p107_p12)
}
  0x1d   :  { %s111_s24 = scalar_lea.hbm %s186_s1, 2048 }
  0x1e   :  { %p112_p13 = scmp.ne.s32.totalorder %s186_s1, %s111_s24  ;;  %p115_p0 = scmp.lt.u32.totalorder %s111_s24, %s186_s1 }
  0x20   :  { %p117_p1 = pnand %p115_p0, %p112_p13 }
  0x22   :  { %120 = shalt.err (!%p117_p1)
}
  0x23   :  { %67 = dma.vmem_to_hbm [thread:$0]  %s62_s21, 2048, %s186_s1, [#allocation4], %s126_s16, %s126_s16, %s127_s17  }
  0x24   :  { %123 = dma.done.wait [#allocation4], 2048  }
  0x25   :  { %124 = vsyncadd [#allocation4], 4294965248 }
  0x26   :  { %71 = vsyncpa [#allocation3], 1 }
  0x27   :  { %72 = vsyncpa [#allocation4], 1 }

</bundles_post_ra>
